<compile_context>
chip_gen: v6e
topology: v6e:2x2x1
jax: 0.10.0
libtpu: 0.0.40
codegen_flags: <defaults>
</compile_context>

<pallas_src>
import numpy as np
import jax
import jax.numpy as jnp
from jax.experimental import pallas as pl
from jax.experimental.pallas import tpu as pltpu

GAMMA = 4.5        # focal gamma
ALPHA = 0.1        # focal alpha
SMOOTH = 1e-5      # dice smooth
EPS_DICE = 1e-7    # dice eps (clamp_min on denominator)
EPS_FOCAL = 1e-6   # focal normalization eps (clamp_min on sum of focal terms)

LANE = 128
SUB = 8
GROUP_ELEMS = SUB * LANE      # 1024 elements per (8,128) group
G_MAX = 256                   # groups per block -> 2048x128 elems (1 MiB f32/stream/buffer)
NSPLIT = 2                    # "parallel" axis; shards across TensorCores on megacore parts


def _cdiv(a, b):
    return -(-a // b)


def _partial_sums_kernel(x_ref, y_ref, o_ref):
    # x_ref / y_ref: (G, 8, 128) block of logits / targets.
    # o_ref: (1, 5, 8, 128) per-core partial-sum accumulator; its block index only
    #        depends on the parallel axis, so it stays VMEM-resident across the
    #        whole "arbitrary" axis (accumulator pattern).
    i = pl.program_id(1)

    @pl.when(i == 0)
    def _():
        o_ref[...] = jnp.zeros_like(o_ref)

    x = x_ref[...].astype(jnp.float32)
    y = y_ref[...].astype(jnp.float32)

    # One shared exponential: e = exp(-|x|)  (EUP)
    e = jnp.exp(-jnp.abs(x))
    inv = 1.0 / (1.0 + e)
    p = jnp.where(x >= 0.0, inv, e * inv)            # sigmoid(x)

    # Stable BCE-with-logits, reusing e:  max(x,0) - x*y + log1p(exp(-|x|))
    logpt = jnp.maximum(x, 0.0) - x * y + jnp.log1p(e)
    # For 0/1 targets: exp(-logpt) == p*y + (1-p)*(1-y)  -> no extra exp
    pt = p * y + (1.0 - p) * (1.0 - y)
    t = jnp.maximum(1.0 - pt, 0.0)
    t2 = t * t
    ft = (t2 * t2) * jnp.sqrt(t)                     # t**4.5 without pow (log+exp)
    fe = ft * logpt * ((1.0 - ALPHA) + (2.0 * ALPHA - 1.0) * y)

    def fold(v):
        # Reduce only the leading (group) axis: pure vreg adds on the VPU,
        # keeps lane/sublane positions as 1024 independent accumulators.
        return jnp.sum(v, axis=0)                    # (G,8,128) -> (8,128)

    o_ref[0, 0] += fold(p * y)   # dice intersection
    o_ref[0, 1] += fold(p)       # sum of probabilities
    o_ref[0, 2] += fold(y)       # sum of targets (dice empty-mask gate)
    o_ref[0, 3] += fold(ft)      # focal normalization factor
    o_ref[0, 4] += fold(fe)      # focal numerator


def custom_focal_dice_loss(x, y):
    """Pallas implementation of CustomFocalDiceLossb.forward(x, y) -> scalar."""
    n = int(np.prod(x.shape))

    # Keep the incoming dtypes (bf16 logits stream half the HBM bytes); only
    # guarantee floating point. The kernel upcasts to f32 internally.
    if not jnp.issubdtype(x.dtype, jnp.floating):
        x = x.astype(jnp.float32)
    if not jnp.issubdtype(y.dtype, jnp.floating):
        y = y.astype(jnp.float32)

    xf = x.reshape(-1)
    yf = y.reshape(-1)

    groups_needed = max(1, _cdiv(n, GROUP_ELEMS))
    g_block = max(1, min(G_MAX, _cdiv(groups_needed, NSPLIT)))
    steps = _cdiv(groups_needed, NSPLIT * g_block)
    total_groups = NSPLIT * steps * g_block
    pad = total_groups * GROUP_ELEMS - n

    # Pad logits with a large negative value and targets with zero: for such
    # elements p=0, y=0, logpt=0, ft=0, fe=0, so every accumulated sum gets an
    # exact zero contribution -> no mask stream and no in-kernel mask needed.
    xf = jnp.pad(xf, (0, pad), constant_values=-1e4)
    yf = jnp.pad(yf, (0, pad), constant_values=0)

    x3 = xf.reshape(total_groups, SUB, LANE)
    y3 = yf.reshape(total_groups, SUB, LANE)

    in_map = lambda c, i: (c * steps + i, 0, 0)

    partials = pl.pallas_call(
        _partial_sums_kernel,
        out_shape=jax.ShapeDtypeStruct((NSPLIT, 5, SUB, LANE), jnp.float32),
        grid_spec=pltpu.PrefetchScalarGridSpec(
            num_scalar_prefetch=0,
            grid=(NSPLIT, steps),
            in_specs=[
                pl.BlockSpec((g_block, SUB, LANE), in_map),
                pl.BlockSpec((g_block, SUB, LANE), in_map),
            ],
            out_specs=pl.BlockSpec((1, 5, SUB, LANE), lambda c, i: (c, 0, 0, 0)),
        ),
        compiler_params=pltpu.CompilerParams(
            dimension_semantics=("parallel", "arbitrary"),
        ),
    )(x3, y3)

    # Final cross-core / cross-lane reductions and loss combine in plain JAX.
    sums = jnp.sum(partials, axis=(0, 2, 3))          # (5,)
    inter, sum_p, sum_y, ft_sum, fe_sum = (sums[k] for k in range(5))

    card = sum_p + sum_y
    dice_score = (2.0 * inter + SMOOTH) / jnp.maximum(card + SMOOTH, EPS_DICE)
    dice_loss = (1.0 - dice_score) * (sum_y > 0.0).astype(jnp.float32)

    focal_loss = fe_sum / jnp.maximum(ft_sum, EPS_FOCAL) / float(n)

    return dice_loss + focal_loss


def _reference_loss(x, y):
    """Pure-JAX reference (mirrors smp DiceLoss + FocalLoss binary semantics)."""
    xf = x.reshape(-1).astype(jnp.float32)
    yf = y.reshape(-1).astype(jnp.float32)
    n = xf.shape[0]

    p = jax.nn.sigmoid(xf)
    inter = jnp.sum(p * yf)
    card = jnp.sum(p + yf)
    dice = (2.0 * inter + SMOOTH) / jnp.maximum(card + SMOOTH, EPS_DICE)
    dice_loss = (1.0 - dice) * (jnp.sum(yf) > 0.0).astype(jnp.float32)

    logpt = jnp.maximum(xf, 0.0) - xf * yf + jnp.log1p(jnp.exp(-jnp.abs(xf)))
    pt = jnp.exp(-logpt)
    ft = jnp.maximum(1.0 - pt, 0.0) ** GAMMA
    fe = ft * logpt * (ALPHA * yf + (1.0 - ALPHA) * (1.0 - yf))
    focal = jnp.sum(fe) / jnp.maximum(jnp.sum(ft), EPS_FOCAL) / n

    return dice_loss + focal


if __name__ == "__main__":
    key = jax.random.PRNGKey(0)
    kx1, ky1, kx2, ky2 = jax.random.split(key, 4)

    # Small NCHW binary-segmentation case (exercises the padding path).
    B, C, H, W = 2, 1, 16, 16
    x1 = jax.random.normal(kx1, (B, C, H, W), dtype=jnp.float32)
    y1 = (jax.random.uniform(ky1, (B, C, H, W)) > 0.5).astype(jnp.float32)

    out1 = jax.block_until_ready(custom_focal_dice_loss(x1, y1))
    ref1 = jax.block_until_ready(_reference_loss(x1, y1))
    np.testing.assert_allclose(np.asarray(out1), np.asarray(ref1), rtol=1e-4, atol=1e-5)

    # Larger case: multiple blocks per core along the "arbitrary" axis.
    B, C, H, W = 2, 1, 1024, 512
    x2 = jax.random.normal(kx2, (B, C, H, W), dtype=jnp.float32)
    y2 = (jax.random.uniform(ky2, (B, C, H, W)) > 0.5).astype(jnp.float32)

    out2 = jax.block_until_ready(custom_focal_dice_loss(x2, y2))
    ref2 = jax.block_until_ready(_reference_loss(x2, y2))
    np.testing.assert_allclose(np.asarray(out2), np.asarray(ref2), rtol=1e-4, atol=1e-5)

    print("KERNEL_OK")
</pallas_src>

<mosaic_0001>
module attributes {stable_mosaic.version = 11 : i64} {
  func.func @_partial_sums_kernel(%arg0: i32, %arg1: i32, %arg2: memref<1x8x128xf32, #tpu.memory_space<vmem>>, %arg3: memref<1x8x128xf32, #tpu.memory_space<vmem>>, %arg4: memref<1x5x8x128xf32, #tpu.memory_space<vmem>>) attributes {dimension_semantics = [#tpu.dimension_semantics<parallel>, #tpu.dimension_semantics<arbitrary>], iteration_bounds = array<i64: 2, 1>, scalar_prefetch = 0 : i64, scratch_operands = 0 : i64, tpu.core_type = #tpu.core_type<tc>, window_params = [{transform_indices = @transform_0, window_bounds = array<i64: 1, 8, 128>}, {transform_indices = @transform_1, window_bounds = array<i64: 1, 8, 128>}, {transform_indices = @transform_2, window_bounds = array<i64: 1, 5, 8, 128>}]} {
    %c0_i32 = arith.constant 0 : i32
    %0 = arith.cmpi eq, %arg1, %c0_i32 : i32
    %1 = arith.extui %0 : i1 to i32
    %c0_i32_0 = arith.constant 0 : i32
    %2 = arith.cmpi ne, %1, %c0_i32_0 : i32
    scf.if %2 {
      %cst_57 = arith.constant 0.000000e+00 : f32
      %80 = vector.broadcast %cst_57 : f32 to vector<1x5x8x128xf32>
      %c0_58 = arith.constant 0 : index
      %c0_59 = arith.constant 0 : index
      %c0_60 = arith.constant 0 : index
      %c0_61 = arith.constant 0 : index
      %81 = vector.load %arg4[%c0_58, %c0_59, %c0_60, %c0_61] : memref<1x5x8x128xf32, #tpu.memory_space<vmem>>, vector<1x5x8x128xf32>
      tpu.vector_store %arg4[%c0_58, %c0_59, %c0_60, %c0_61], %80 {strides = array<i32>} : memref<1x5x8x128xf32, #tpu.memory_space<vmem>>, vector<1x5x8x128xf32>,
    } else {
    }
    %c0 = arith.constant 0 : index
    %c0_1 = arith.constant 0 : index
    %c0_2 = arith.constant 0 : index
    %3 = vector.load %arg2[%c0, %c0_1, %c0_2] : memref<1x8x128xf32, #tpu.memory_space<vmem>>, vector<1x8x128xf32>
    %c0_3 = arith.constant 0 : index
    %c0_4 = arith.constant 0 : index
    %c0_5 = arith.constant 0 : index
    %4 = vector.load %arg3[%c0_3, %c0_4, %c0_5] : memref<1x8x128xf32, #tpu.memory_space<vmem>>, vector<1x8x128xf32>
    %5 = math.absf %3 : vector<1x8x128xf32>
    %cst = arith.constant 0.000000e+00 : f32
    %6 = vector.broadcast %cst : f32 to vector<1x8x128xf32>
    %7 = arith.subf %6, %5 : vector<1x8x128xf32>
    %8 = math.exp %7 : vector<1x8x128xf32>
    %cst_6 = arith.constant 1.000000e+00 : f32
    %9 = vector.broadcast %cst_6 : f32 to vector<1x8x128xf32>
    %10 = arith.addf %9, %8 : vector<1x8x128xf32>
    %cst_7 = arith.constant 1.000000e+00 : f32
    %11 = vector.broadcast %cst_7 : f32 to vector<1x8x128xf32>
    %12 = arith.divf %11, %10 : vector<1x8x128xf32>
    %cst_8 = arith.constant 0.000000e+00 : f32
    %13 = vector.broadcast %cst_8 : f32 to vector<1x8x128xf32>
    %14 = arith.cmpf oge, %3, %13 : vector<1x8x128xf32>
    %15 = arith.mulf %8, %12 : vector<1x8x128xf32>
    %16 = arith.select %14, %12, %15 : vector<1x8x128xi1>, vector<1x8x128xf32>
    %cst_9 = arith.constant 0.000000e+00 : f32
    %17 = vector.broadcast %cst_9 : f32 to vector<1x8x128xf32>
    %18 = arith.maximumf %3, %17 : vector<1x8x128xf32>
    %19 = arith.mulf %3, %4 : vector<1x8x128xf32>
    %20 = arith.subf %18, %19 : vector<1x8x128xf32>
    %21 = math.log1p %8 : vector<1x8x128xf32>
    %22 = arith.addf %20, %21 : vector<1x8x128xf32>
    %23 = arith.mulf %16, %4 : vector<1x8x128xf32>
    %cst_10 = arith.constant 1.000000e+00 : f32
    %24 = vector.broadcast %cst_10 : f32 to vector<1x8x128xf32>
    %25 = arith.subf %24, %16 : vector<1x8x128xf32>
    %cst_11 = arith.constant 1.000000e+00 : f32
    %26 = vector.broadcast %cst_11 : f32 to vector<1x8x128xf32>
    %27 = arith.subf %26, %4 : vector<1x8x128xf32>
    %28 = arith.mulf %25, %27 : vector<1x8x128xf32>
    %29 = arith.addf %23, %28 : vector<1x8x128xf32>
    %cst_12 = arith.constant 1.000000e+00 : f32
    %30 = vector.broadcast %cst_12 : f32 to vector<1x8x128xf32>
    %31 = arith.subf %30, %29 : vector<1x8x128xf32>
    %cst_13 = arith.constant 0.000000e+00 : f32
    %32 = vector.broadcast %cst_13 : f32 to vector<1x8x128xf32>
    %33 = arith.maximumf %31, %32 : vector<1x8x128xf32>
    %34 = arith.mulf %33, %33 : vector<1x8x128xf32>
    %35 = arith.mulf %34, %34 : vector<1x8x128xf32>
    %36 = math.sqrt %33 : vector<1x8x128xf32>
    %37 = arith.mulf %35, %36 : vector<1x8x128xf32>
    %38 = arith.mulf %37, %22 : vector<1x8x128xf32>
    %cst_14 = arith.constant -8.000000e-01 : f32
    %39 = vector.broadcast %cst_14 : f32 to vector<1x8x128xf32>
    %40 = arith.mulf %39, %4 : vector<1x8x128xf32>
    %cst_15 = arith.constant 0.899999976 : f32
    %41 = vector.broadcast %cst_15 : f32 to vector<1x8x128xf32>
    %42 = arith.addf %41, %40 : vector<1x8x128xf32>
    %43 = arith.mulf %38, %42 : vector<1x8x128xf32>
    %c0_16 = arith.constant 0 : index
    %c0_17 = arith.constant 0 : index
    %c0_18 = arith.constant 0 : index
    %c0_19 = arith.constant 0 : index
    %44 = vector.load %arg4[%c0_16, %c0_17, %c0_18, %c0_19] : memref<1x5x8x128xf32, #tpu.memory_space<vmem>>, vector<1x1x8x128xf32>
    %45 = vector.shape_cast %44 : vector<1x1x8x128xf32> to vector<8x128xf32>
    %46 = arith.mulf %16, %4 : vector<1x8x128xf32>
    %cst_20 = arith.constant dense<0.000000e+00> : vector<8x128xf32>
    %47 = vector.multi_reduction <add>, %46, %cst_20 [0] : vector<1x8x128xf32> to vector<8x128xf32>
    %48 = arith.addf %45, %47 : vector<8x128xf32>
    %c0_21 = arith.constant 0 : index
    %c0_22 = arith.constant 0 : index
    %c0_23 = arith.constant 0 : index
    %c0_24 = arith.constant 0 : index
    %49 = vector.load %arg4[%c0_21, %c0_22, %c0_23, %c0_24] : memref<1x5x8x128xf32, #tpu.memory_space<vmem>>, vector<1x1x8x128xf32>
    %50 = vector.shape_cast %49 : vector<1x1x8x128xf32> to vector<8x128xf32>
    %51 = vector.shape_cast %48 : vector<8x128xf32> to vector<1x1x8x128xf32>
    tpu.vector_store %arg4[%c0_21, %c0_22, %c0_23, %c0_24], %51 {strides = array<i32>} : memref<1x5x8x128xf32, #tpu.memory_space<vmem>>, vector<1x1x8x128xf32>,
    %c0_25 = arith.constant 0 : index
    %c1 = arith.constant 1 : index
    %c0_26 = arith.constant 0 : index
    %c0_27 = arith.constant 0 : index
    %52 = vector.load %arg4[%c0_25, %c1, %c0_26, %c0_27] : memref<1x5x8x128xf32, #tpu.memory_space<vmem>>, vector<1x1x8x128xf32>
    %53 = vector.shape_cast %52 : vector<1x1x8x128xf32> to vector<8x128xf32>
    %cst_28 = arith.constant dense<0.000000e+00> : vector<8x128xf32>
    %54 = vector.multi_reduction <add>, %16, %cst_28 [0] : vector<1x8x128xf32> to vector<8x128xf32>
    %55 = arith.addf %53, %54 : vector<8x128xf32>
    %c0_29 = arith.constant 0 : index
    %c1_30 = arith.constant 1 : index
    %c0_31 = arith.constant 0 : index
    %c0_32 = arith.constant 0 : index
    %56 = vector.load %arg4[%c0_29, %c1_30, %c0_31, %c0_32] : memref<1x5x8x128xf32, #tpu.memory_space<vmem>>, vector<1x1x8x128xf32>
    %57 = vector.shape_cast %56 : vector<1x1x8x128xf32> to vector<8x128xf32>
    %58 = vector.shape_cast %55 : vector<8x128xf32> to vector<1x1x8x128xf32>
    tpu.vector_store %arg4[%c0_29, %c1_30, %c0_31, %c0_32], %58 {strides = array<i32>} : memref<1x5x8x128xf32, #tpu.memory_space<vmem>>, vector<1x1x8x128xf32>,
    %c0_33 = arith.constant 0 : index
    %c2 = arith.constant 2 : index
    %c0_34 = arith.constant 0 : index
    %c0_35 = arith.constant 0 : index
    %59 = vector.load %arg4[%c0_33, %c2, %c0_34, %c0_35] : memref<1x5x8x128xf32, #tpu.memory_space<vmem>>, vector<1x1x8x128xf32>
    %60 = vector.shape_cast %59 : vector<1x1x8x128xf32> to vector<8x128xf32>
    %cst_36 = arith.constant dense<0.000000e+00> : vector<8x128xf32>
    %61 = vector.multi_reduction <add>, %4, %cst_36 [0] : vector<1x8x128xf32> to vector<8x128xf32>
    %62 = arith.addf %60, %61 : vector<8x128xf32>
    %c0_37 = arith.constant 0 : index
    %c2_38 = arith.constant 2 : index
    %c0_39 = arith.constant 0 : index
    %c0_40 = arith.constant 0 : index
    %63 = vector.load %arg4[%c0_37, %c2_38, %c0_39, %c0_40] : memref<1x5x8x128xf32, #tpu.memory_space<vmem>>, vector<1x1x8x128xf32>
    %64 = vector.shape_cast %63 : vector<1x1x8x128xf32> to vector<8x128xf32>
    %65 = vector.shape_cast %62 : vector<8x128xf32> to vector<1x1x8x128xf32>
    tpu.vector_store %arg4[%c0_37, %c2_38, %c0_39, %c0_40], %65 {strides = array<i32>} : memref<1x5x8x128xf32, #tpu.memory_space<vmem>>, vector<1x1x8x128xf32>,
    %c0_41 = arith.constant 0 : index
    %c3 = arith.constant 3 : index
    %c0_42 = arith.constant 0 : index
    %c0_43 = arith.constant 0 : index
    %66 = vector.load %arg4[%c0_41, %c3, %c0_42, %c0_43] : memref<1x5x8x128xf32, #tpu.memory_space<vmem>>, vector<1x1x8x128xf32>
    %67 = vector.shape_cast %66 : vector<1x1x8x128xf32> to vector<8x128xf32>
    %cst_44 = arith.constant dense<0.000000e+00> : vector<8x128xf32>
    %68 = vector.multi_reduction <add>, %37, %cst_44 [0] : vector<1x8x128xf32> to vector<8x128xf32>
    %69 = arith.addf %67, %68 : vector<8x128xf32>
    %c0_45 = arith.constant 0 : index
    %c3_46 = arith.constant 3 : index
    %c0_47 = arith.constant 0 : index
    %c0_48 = arith.constant 0 : index
    %70 = vector.load %arg4[%c0_45, %c3_46, %c0_47, %c0_48] : memref<1x5x8x128xf32, #tpu.memory_space<vmem>>, vector<1x1x8x128xf32>
    %71 = vector.shape_cast %70 : vector<1x1x8x128xf32> to vector<8x128xf32>
    %72 = vector.shape_cast %69 : vector<8x128xf32> to vector<1x1x8x128xf32>
    tpu.vector_store %arg4[%c0_45, %c3_46, %c0_47, %c0_48], %72 {strides = array<i32>} : memref<1x5x8x128xf32, #tpu.memory_space<vmem>>, vector<1x1x8x128xf32>,
    %c0_49 = arith.constant 0 : index
    %c4 = arith.constant 4 : index
    %c0_50 = arith.constant 0 : index
    %c0_51 = arith.constant 0 : index
    %73 = vector.load %arg4[%c0_49, %c4, %c0_50, %c0_51] : memref<1x5x8x128xf32, #tpu.memory_space<vmem>>, vector<1x1x8x128xf32>
    %74 = vector.shape_cast %73 : vector<1x1x8x128xf32> to vector<8x128xf32>
    %cst_52 = arith.constant dense<0.000000e+00> : vector<8x128xf32>
    %75 = vector.multi_reduction <add>, %43, %cst_52 [0] : vector<1x8x128xf32> to vector<8x128xf32>
    %76 = arith.addf %74, %75 : vector<8x128xf32>
    %c0_53 = arith.constant 0 : index
    %c4_54 = arith.constant 4 : index
    %c0_55 = arith.constant 0 : index
    %c0_56 = arith.constant 0 : index
    %77 = vector.load %arg4[%c0_53, %c4_54, %c0_55, %c0_56] : memref<1x5x8x128xf32, #tpu.memory_space<vmem>>, vector<1x1x8x128xf32>
    %78 = vector.shape_cast %77 : vector<1x1x8x128xf32> to vector<8x128xf32>
    %79 = vector.shape_cast %76 : vector<8x128xf32> to vector<1x1x8x128xf32>
    tpu.vector_store %arg4[%c0_53, %c4_54, %c0_55, %c0_56], %79 {strides = array<i32>} : memref<1x5x8x128xf32, #tpu.memory_space<vmem>>, vector<1x1x8x128xf32>,
    return
  }
  func.func @transform_0(%arg0: i32, %arg1: i32) -> (i32, i32, i32) {
    %c1_i32 = arith.constant 1 : i32
    %0 = arith.muli %arg0, %c1_i32 : i32
    %1 = arith.addi %0, %arg1 : i32
    %c0_i32 = arith.constant 0 : i32
    %c0_i32_0 = arith.constant 0 : i32
    %c0_i32_1 = arith.constant 0 : i32
    return %1, %c0_i32, %c0_i32_0 : i32, i32, i32
  }
  func.func @transform_1(%arg0: i32, %arg1: i32) -> (i32, i32, i32) {
    %c1_i32 = arith.constant 1 : i32
    %0 = arith.muli %arg0, %c1_i32 : i32
    %1 = arith.addi %0, %arg1 : i32
    %c0_i32 = arith.constant 0 : i32
    %c0_i32_0 = arith.constant 0 : i32
    %c0_i32_1 = arith.constant 0 : i32
    return %1, %c0_i32, %c0_i32_0 : i32, i32, i32
  }
  func.func @transform_2(%arg0: i32, %arg1: i32) -> (i32, i32, i32, i32) {
    %c0_i32 = arith.constant 0 : i32
    %c0_i32_0 = arith.constant 0 : i32
    %c0_i32_1 = arith.constant 0 : i32
    %c0_i32_2 = arith.constant 0 : i32
    return %arg0, %c0_i32, %c0_i32_0, %c0_i32_1 : i32, i32, i32, i32
  }
}

</mosaic_0001>

<bundles_post_ra>
// kernel: tpu_custom_call.1
= control target key start
LH: loop header
LB: loop body
LE: loop exit
PB: predicated region body
PF: predicated region fallthrough
CT: control target
= control target key end

     0   :  { %7 = vsyncpa [#allocation3], 0  ;;  %s863_s0 = inlined_call_operand.hbm [shape: f32[2,8,128], index: 0, kind: input, shape index: {}]   ;;  %s864_s1 = inlined_call_operand.hbm [shape: f32[2,8,128], index: 1, kind: input, shape index: {}]   ;;  %s865_s2 = inlined_call_operand.hbm [shape: f32[2,5,8,128], index: 2, kind: output, shape index: {}]  }
   0x1   :  { %9 = vsyncpa [#allocation3 + $0x1], 0 }
   0x2   :  { %10 = vsyncpa [#allocation6], 0 }
   0x3   :  { %12 = vsyncpa [#allocation6 + $0x1], 0 }
   0x4   :  { %13 = vsyncpa [#allocation4], 0 }
   0x5   :  { %15 = vsyncpa [#allocation4 + $0x1], 0  ;;  %s679_s9 = smov 0   ;;  %s681_s10 = smov 0  }
   0x6   :  { %s683_s11 = smov 0   ;;  %s685_s12 = smov 0  }
   0x7   :  { %s687_s13 = smov 0   ;;  %s689_s14 = smov 0  }
   0x8 LB: > { %s415_s15 = sadd.s32 4294967295, %s657_s14   ;;  %s416_s16 = sadd.s32 4294967294, %s657_s14   ;;  %s657_s14 = sphi %s689_s14, %s21_s14   ;;  %s653_s13 = sphi %s687_s13, %s877_s13   ;;  %s649_s12 = sphi %s685_s12, %s876_s12   ;;  %s645_s11 = sphi %s683_s11, %s875_s11   ;;  %s641_s10 = sphi %s681_s10, %s874_s10   ;;  %s637_s9 = sphi %s679_s9, %s873_s9  }
   0x9   : > { %s33_s17 = sadd.s32 1, %s653_s13  ;;  %s42_s18 = sadd.s32 1, %s645_s11 }
   0xa   : > { %p35_p0 = scmp.ge.s32.totalorder %s33_s17, 2  ;;  %p49_p1 = scmp.ne.s32.totalorder %s645_s11, %s641_s10 }
   0xb   : > { %p50_p2 = scmp.eq.s32.totalorder %s657_s14, 0  ;;  %p55_p3 = scmp.ne.s32.totalorder %s641_s10, %s637_s9 }
   0xc   : > { %s879_s17 = smov (%p35_p0, %s33_s17), 0  ;;  %p56_p5 = scmp.eq.s32.totalorder %s415_s15, 0 }
   0xd   : > { %p720_p4 = por %p50_p2, %p49_p1  ;;  %s39_s20 = ssub.s32 %s653_s13, %s879_s17 }
   0xe   : > { %p107_p6 = scmp.eq.s32.totalorder %s415_s15, 1  ;;  %p40_p7 = scmp.eq.s32.totalorder %s39_s20, 0 }
   0xf   : > { %p726_p8 = por %p56_p5, %p55_p3  ;;  %p113_p10 = scmp.eq.s32.totalorder %s416_s16, 1 }
  0x10   : > { %p730_p9 = por %p107_p6, %p49_p1  ;;  %p456_p13 = scmp.lt.s32.totalorder %s657_s14, 2 }
  0x11   : > { %s735_s23 = scalar_select %p40_p7, %s645_s11, %s42_s18  }
  0x12   : > { %p737_p11 = por %p113_p10, %p55_p3  ;;  %s744_s25 = sand.u32 1, %s645_s11  }
  0x13   : > { %s419_s26 = sshll.u32 %s744_s25, 3  ;;  %s420_s27 = sshll.u32 %s653_s13, 7 }
  0x14   : > { %s143_s30 = scalar_lea.hbm %s863_s0, %s420_s27  ;;  %s137_s3 = scalar_lea.vmem [#allocation2], %s419_s26 }
  0x15   : > { %s145_s4 = sshll.u32 %s137_s3, 4  ;;  %p753_p0 = pnand %p456_p13, %p720_p4  ;;  %s146_s4 = int_to_ptr.vmem [resolvable:$true] %s145_s4 }
  0x16   : > { %p423_p1 = scmp.ge.s32.totalorder %s657_s14, 1  ;;  %p169_p2 = scmp.lt.s32.totalorder %s657_s14, 3 }
  0x17   : > { %s134_s6 = scalar_lea.sflag [#allocation3], %s744_s25  ;;  %p519_p3 = pneg %p753_p0 }
  0x18   : > { %s530_s7 = scalar_lea.vmem %s146_s4, 128  ;;  %s659_s8 = smov [#allocation2]  }
  0x19   : > { %p531_p5 = scmp.ne.s32.totalorder %s146_s4, %s530_s7  ;;  %s535_s15 = sshll.u32 %s659_s8, 4  ;;  %s536_s15 = int_to_ptr.vmem [resolvable:$false] %s535_s15 }
  0x1a   : > { %s537_s16 = scalar_lea.vmem %s536_s15, 256  ;;  %p538_p4 = scmp.lt.s32.totalorder %s146_s4, %s536_s15 }
  0x1b   : > { %p533_p6 = pnand %p531_p5, %p519_p3  ;;  %p539_p10 = scmp.lt.s32.totalorder %s537_s16, %s530_s7 }
  0x1d   : > { %p534_p7 = pneg %p533_p6  ;;  %p540_p13 = por %p539_p10, %p538_p4 }
  0x1f   : > { %p541_p12 = pnand %p540_p13, %p534_p7 }
  0x21   : > { %544 = shalt.err (!%p541_p12)
}
  0x22   : > { %448 = dma.hbm_to_vmem [thread:$0]  (!%p753_p0), %s143_s30, 128, %s146_s4, %s134_s6  }
  0x23   : > { %p771_p5 = pnand %p423_p1, %p169_p2  ;;  %s162_s28 = scalar_lea.hbm %s864_s1, %s420_s27 }
  0x24   : > { %s156_s29 = scalar_lea.vmem [#allocation5], %s419_s26  ;;  %s153_s7 = scalar_lea.sflag [#allocation6], %s744_s25 }
  0x25   : > { %s164_s3 = sshll.u32 %s156_s29, 4  ;;  %s660_s30 = smov [#allocation5]   ;;  %s165_s3 = int_to_ptr.vmem [resolvable:$true] %s164_s3 }
  0x26   : > { %s558_s8 = scalar_lea.vmem %s165_s3, 128  ;;  %s563_s4 = sshll.u32 %s660_s30, 4  ;;  %s564_s4 = int_to_ptr.vmem [resolvable:$false] %s563_s4 }
  0x27   : > { %p559_p12 = scmp.ne.s32.totalorder %s165_s3, %s558_s8  ;;  %s565_s6 = scalar_lea.vmem %s564_s4, 256 }
  0x28   : > { %p566_p1 = scmp.lt.s32.totalorder %s165_s3, %s564_s4  ;;  %p567_p2 = scmp.lt.s32.totalorder %s565_s6, %s558_s8 }
  0x29   : > { %p561_p6 = pnand %p559_p12, %p519_p3 }
  0x2a   : > { %p568_p4 = por %p567_p2, %p566_p1 }
  0x2b   : > { %p562_p7 = pneg %p561_p6 }
  0x2d   : > { %p569_p10 = pnand %p568_p4, %p562_p7 }
  0x2f   : > { %572 = shalt.err (!%p569_p10)
}
  0x30   : > { %451 = dma.hbm_to_vmem [thread:$0]  (!%p753_p0), %s162_s28, 128, %s165_s3, %s153_s7  }
  0x31   : > { %173 = sbr.rel (%p771_p5) target bundleno = 145 (0x91), region = 28  ;;  %s787_s25 = sand.u32 (!%p771_p5), 1, %s641_s10  }
  0x32   : > { %s424_s26 = sshll.u32 (!%p771_p5), %s787_s25, 3  ;;  %s176_s27 = scalar_lea.sflag (!%p771_p5), [#allocation3], %s787_s25 }
  0x33   : > { %s179_s15 = scalar_lea.vmem (!%p771_p5), [#allocation2], %s424_s26 }
  0x36   : > { %624 = dma.done.wait (%p726_p8), %s176_s27, 128  }
  0x37   : > { %626 = vsyncadd (%p726_p8), %s176_s27, 4294967168  ;;  %s185_s5 = scalar_lea.sflag [#allocation6], %s787_s25  ;;  %s188_s16 = scalar_lea.vmem [#allocation5], %s424_s26 }
  0x38   : > { %628 = dma.done.wait (%p726_p8), %s185_s5, 128  }
  0x39   : > { %630 = vsyncadd (%p726_p8), %s185_s5, 4294967168  ;;  %s437_s18 = smul.u32 40, %s787_s25  ;;  %v225_v0 = vld [vmem:[%s179_s15] sm:$0xff]  ;;  %v226_v1 = vld [vmem:[%s188_s16] sm:$0xff]  ;;  %s296_s7 = scalar_lea.sflag [#allocation4], %s787_s25 }
  0x3a   : > { %v227_v2 = vand.u32 2147483647, %v225_v0  ;;  %vm234_vm0 = vcmp.ge.f32.partialorder %v225_v0, 0.0  ;;  %v252_v9 = vsub.f32 1.0, %v226_v1  ;;  %v237_v21 = vmax.f32 %v225_v0, 0.0  ;;  %s438_s21 = smul.u32 640, %s649_s12 }
  0x3b   : > { %s801_s19 = scalar_lea.vmem [#allocation7], %s437_s18  ;;  %v238_v22 = vmul.f32 %v226_v1, %v225_v0  ;;  %v268_v32 = vmul.f32 -0.8, %v226_v1  ;;  %s661_s12 = smov [#allocation7]  }
  0x3c   : > { %v228_v3 = vsub.f32 0.0, %v227_v2  ;;  %429 = vst [vmem:[%s801_s19 + $0x10] sm:$0xff] %v226_v1  ;;  %s309_s20 = sshll.u32 %s801_s19, 4  ;;  %s812_s3 = scalar_lea.hbm %s865_s2, %s438_s21  ;;  %s814_s20 = int_to_ptr.vmem [resolvable:$true] %s309_s20 }
  0x3d   : > { %v239_v26 = vsub.f32 %v237_v21, %v238_v22  ;;  %v269_v37 = vadd.f32 0.9, %v268_v32  ;;  %s573_s8 = scalar_lea.vmem %s814_s20, 640  ;;  %s577_s30 = sshll.u32 %s661_s12, 4  ;;  %s578_s30 = int_to_ptr.vmem [resolvable:$false] %s577_s30 }
  0x3e   : > { %v229_v4 = vmul.f32 1.442695, %v228_v3  ;;  %p574_p8 = scmp.ne.s32.totalorder %s814_s20, %s573_s8  ;;  %s579_s4 = scalar_lea.vmem %s578_s30, 1280 }
  0x3f   : > { %p580_p13 = scmp.lt.s32.totalorder %s814_s20, %s578_s30  ;;  %p581_p5 = scmp.lt.s32.totalorder %s579_s4, %s573_s8 }
  0x40   : > { %509 = vpow2.f32 %v229_v4  ;;  %p575_p0 = pnand %p574_p8, %p730_p9 }
  0x41   : > { %p582_p12 = por %p581_p5, %p580_p13 }
  0x42   : > { %p576_p3 = pneg %p575_p0 }
  0x44   : > { %p583_p6 = pnand %p582_p12, %p576_p3 }
  0x4d   : > { %v510_v5 = vpop.eup %509 }
  0x4e   : > { %v231_v6 = vadd.f32 1.0, %v510_v5  ;;  %v243_v17 = vmul.f32 -0.5, %v510_v5  ;;  %v246_v20 = vand.u32 2147483647, %v510_v5 }
  0x50   : > { %511 = vrcp.f32 %v231_v6  ;;  %v244_v18 = vadd.f32 1.0, %v243_v17  ;;  %vm247_vm1 = vcmp.lt.f32.partialorder %v246_v20, 0.0004427343 }
  0x51   : > { %513 = vlog2.f32 %v231_v6 }
  0x52   : > { %v245_v24 = vmul.f32 %v510_v5, %v244_v18 }
  0x5d   : > { %v512_v7 = vpop.eup %511 }
  0x5e   : > { %v235_v8 = vmul.f32 %v512_v7, %v510_v5  ;;  %v514_v19 = vpop.eup %513 }
  0x5f   : > { %v242_v23 = vmul.f32 0.6931472, %v514_v19 }
  0x60   : > { %v236_v10 = vsel %vm234_vm0, %v512_v7, %v235_v8 }
  0x61   : > { %v250_v11 = vmul.f32 %v236_v10, %v226_v1  ;;  %v251_v12 = vsub.f32 1.0, %v236_v10  ;;  %427 = vst [vmem:[%s801_s19 + $0x8] sm:$0xff] %v236_v10  ;;  %v248_v29 = vsel %vm247_vm1, %v245_v24, %v242_v23 }
  0x62   : > { %v249_v34 = vadd.f32 %v248_v29, %v239_v26 }
  0x63   : > { %v253_v13 = vmul.f32 %v252_v9, %v251_v12  ;;  %274 = vst [vmem:[%s801_s19] sm:$0xff] %v250_v11 }
  0x65   : > { %v254_v14 = vadd.f32 %v253_v13, %v250_v11 }
  0x67   : > { %v255_v15 = vsub.f32 1.0, %v254_v14 }
  0x69   : > { %v256_v16 = vmax.f32 %v255_v15, 0.0 }
  0x6b   : > { %515 = vrsqrt.f32 %v256_v16  ;;  %v257_v25 = vmul.f32 %v256_v16, %v256_v16  ;;  %vm261_vm2 = vcmp.eq.f32.partialorder %v256_v16, inf  ;;  %v264_v28 = vand.u32 2147483648, %v256_v16 }
  0x6c   : > { %vm263_vm3 = vcmp.eq.f32.partialorder %v256_v16, 0.0 }
  0x6d   : > { %v258_v30 = vmul.f32 %v257_v25, %v257_v25 }
  0x78   : > { %v516_v27 = vpop.eup %515 }
  0x79   : > { %v260_v31 = vmul.f32 %v516_v27, %v256_v16 }
  0x7b   : > { %v262_v33 = vsel %vm261_vm2, %v256_v16, %v260_v31 }
  0x7c   : > { %v265_v35 = vsel %vm263_vm3, %v264_v28, %v262_v33 }
  0x7d   : > { %v266_v36 = vmul.f32 %v265_v35, %v258_v30 }
  0x7f   : > { %v267_v38 = vmul.f32 %v266_v36, %v249_v34  ;;  %431 = vst [vmem:[%s801_s19 + $0x18] sm:$0xff] %v266_v36 }
  0x81   : > { %v270_v39 = vmul.f32 %v269_v37, %v267_v38 }
  0x83   : > { %433 = vst [vmem:[%s801_s19 + $0x20] sm:$0xff] %v270_v39 }
  0x84   : > { %586 = shalt.err (!%p583_p6)
}
  0x85   : > { %s587_s6 = scalar_lea.hbm %s812_s3, 640  ;;  %s591_s15 = scalar_lea.hbm %s865_s2, 1280 }
  0x86   : > { %p588_p7 = scmp.ne.s32.totalorder %s812_s3, %s587_s6  ;;  %p592_p4 = scmp.lt.s32.totalorder %s812_s3, %s865_s2 }
  0x87   : > { %p593_p10 = scmp.lt.s32.totalorder %s591_s15, %s587_s6 }
  0x88   : > { %p589_p1 = pnand %p588_p7, %p730_p9 }
  0x89   : > { %p594_p8 = por %p593_p10, %p592_p4 }
  0x8a   : > { %p590_p2 = pneg %p589_p1 }
  0x8c   : > { %p595_p0 = pnand %p594_p8, %p590_p2 }
  0x8e   : > { %598 = shalt.err (!%p595_p0)
}
  0x8f   : > { %s662_s18 = smov 128   ;;  %s663_s19 = smov 8  }
  0x90   : > { %443 = dma.vmem_to_hbm [thread:$0]  (%p730_p9), %s814_s20, 640, %s812_s3, %s296_s7, %s662_s18, %s662_s18, %s663_s19  }
  0x91 PF: > { %s324_s21 = sand.u32 1, %s637_s9   ;;  %p872_p3 = scmp.ge.s32.totalorder %s657_s14, 2 }
  0x92   : > { %s325_s28 = scalar_lea.sflag [#allocation4], %s324_s21 }
  0x93   : > { %p453_p13 = pnand %p872_p3, %p737_p11 }
  0x95   : > { %p454_p5 = pneg %p453_p13 }
  0x97   : > { %632 = dma.done.wait (%p454_p5), %s325_s28, 640  }
  0x98   : > { %634 = vsyncadd (%p454_p5), %s325_s28, 4294966656  ;;  %s21_s14 = sadd.s32 1, %s657_s14   ;;  %s873_s9 = smov %s641_s10 }
  0x99   : > { %p18_p12 = scmp.ge.s32.totalorder %s21_s14, 4   ;;  %s874_s10 = smov %s645_s11 }
  0x9a   : > { %s875_s11 = smov %s735_s23  ;;  %s876_s12 = smov %s653_s13 }
  0x9b   : > { %s877_s13 = smov %s879_s17  ;;  %20 = sbr.rel (!%p18_p12) target bundleno = 8 (0x8), region = 94 }
  0xa0   :  { %330 = vsyncpa [#allocation3], 1 }
  0xa1   :  { %332 = vsyncpa [#allocation3 + $0x1], 1 }
  0xa2   :  { %333 = vsyncpa [#allocation6], 1 }
  0xa3   :  { %335 = vsyncpa [#allocation6 + $0x1], 1 }
  0xa4   :  { %336 = vsyncpa [#allocation4], 1 }
  0xa5   :  { %338 = vsyncpa [#allocation4 + $0x1], 1 }

</bundles_post_ra>
